<compile_context>
chip_gen: v7x
topology: tpu7x:2x2x1
jax: 0.10.0
libtpu: 0.0.40
codegen_flags: <defaults>
</compile_context>

<pallas_src>
import functools

import jax
import jax.numpy as jnp
from jax.experimental import pallas as pl
from jax.experimental.pallas import tpu as pltpu


def _contrastive_loss_kernel(z1_ref, z2_ref, y_ref, out_ref, *,
                             margin, batch_size, tile_rows, needs_mask):
    z1 = z1_ref[...].astype(jnp.float32)          # (TB, D)
    z2 = z2_ref[...].astype(jnp.float32)          # (TB, D)
    y = y_ref[...].astype(jnp.float32)            # (TB, 1)

    diff = z1 - z2
    d2 = jnp.sum(diff * diff, axis=1, keepdims=True)      # (TB, 1) lane-sparse
    dist = jnp.sqrt(d2)                                    # EUP, rides a free slot
    neg = jnp.maximum(margin - dist, 0.0)
    # y*d2 + (1-y)*neg^2  ==  d2 + (1-y)*(neg^2 - d2)  (one fewer lane-sparse mul).
    # The 0.5 per-sample factor and 1/B mean are folded into the epilogue.
    per_sample = d2 + (1.0 - y) * (neg * neg - d2)         # (TB, 1)

    def _write(vals):
        psum = jnp.sum(vals)                               # scalar f32 partial
        # Lane-dense (1, 8, 128) store; epilogue reads element [0, 0] per block.
        out_ref[...] = jnp.broadcast_to(psum.reshape(1, 1, 1), out_ref.shape)

    if needs_mask:
        # Only the last tile can overflow the true batch; gate the lane-sparse
        # masking work so every full tile skips it entirely.
        i = pl.program_id(0)
        last = pl.num_programs(0) - 1

        @pl.when(i == last)
        def _():
            row = (jax.lax.broadcasted_iota(jnp.int32, per_sample.shape, 0)
                   + i * tile_rows)
            # Select, NOT a multiplicative mask: padded rows are undefined VMEM
            # (possibly Inf/NaN) and must be dropped, not scaled.
            _write(jnp.where(row < batch_size, per_sample, 0.0))

        @pl.when(i != last)
        def _():
            _write(per_sample)
    else:
        _write(per_sample)


def _pick_tile_rows(batch, feat, itemsize):
    """Pick the batch-tile row count.

    Targets ~8 MiB of fresh VMEM per grid step (so 2x-buffered working set stays
    ~16 MiB, safe under v7x's 64 MiB VMEM), caps at 1024 rows (HBM-roofline
    plateau), prefers >= 8 grid steps, and best-effort keeps the tile count even
    so v7x's two TensorCores stay balanced on the 'parallel' grid axis.
    """
    if batch <= 8:
        return max(batch, 1)                     # block == full dim is legal

    b_pad = -(-batch // 8) * 8                   # sublane-padded batch

    # Per-row VMEM bytes for ONE pipeline buffer:
    #   z1 + z2 rows (feat*itemsize each) plus the lane-padded (TB,1) f32 y
    #   block, which really occupies a full 128-lane row => 512 B/row.
    row_bytes = 2 * feat * itemsize + 512
    tb = (8 * 1024 * 1024) // max(row_bytes, 1)  # ~8 MiB per grid step
    tb = max(8, min(tb, 1024, b_pad))            # plateau cap + never exceed batch
    tb = (tb // 8) * 8                           # sublane multiple

    # Keep at least ~8 grid steps when the batch allows it (pipeline depth +
    # >= 4 tiles per TensorCore on 2-TC parts).
    if b_pad >= 64:
        tb = min(tb, max(8, ((b_pad // 8) // 8) * 8))

    def n_tiles(t):
        return -(-batch // t)

    # Best-effort even tile count (v7x shards the parallel axis across 2 TCs).
    nt = n_tiles(tb)
    if nt > 1 and nt % 2 == 1:
        for cand in range(tb - 8, max(tb // 2, 8) - 1, -8):
            if n_tiles(cand) % 2 == 0:
                tb = cand
                break

    return tb


def contrastive_loss(z1, z2, y, margin=2.0):
    """Pallas TPU implementation of ContrastiveLoss.forward.

    z1, z2: (B, D) arrays (f32 or bf16); y: (B,) labels (0/1). Returns f32 loss.
    """
    B, D = z1.shape
    assert z2.shape == (B, D)
    y2d = y.reshape(B, 1).astype(jnp.float32)

    itemsize = max(jnp.dtype(z1.dtype).itemsize, jnp.dtype(z2.dtype).itemsize)
    TB = _pick_tile_rows(B, D, itemsize)
    num_tiles = -(-B // TB)                       # cdiv
    needs_mask = (B % TB) != 0

    # Real per-step working set (double-buffered inputs + lane-padded y + out),
    # with a little headroom; capped at 48 MiB so it is safe on v7x (64 MiB VMEM)
    # and never greedy on v5e/v6e.
    working = (2 * 2 * TB * D * itemsize          # z1 + z2, 2 pipeline buffers
               + 2 * TB * 128 * 4                 # (TB,1) f32 y, lane-padded, 2 bufs
               + 2 * 8 * 128 * 4)                 # (1,8,128) f32 out, 2 bufs
    vmem_limit = min(48 * 1024 * 1024,
                     max(32 * 1024 * 1024, working + 4 * 1024 * 1024))

    kernel = functools.partial(
        _contrastive_loss_kernel,
        margin=float(margin), batch_size=B, tile_rows=TB, needs_mask=needs_mask,
    )

    partials = pl.pallas_call(
        kernel,
        out_shape=jax.ShapeDtypeStruct((num_tiles, 8, 128), jnp.float32),
        grid_spec=pltpu.PrefetchScalarGridSpec(
            num_scalar_prefetch=0,
            grid=(num_tiles,),
            in_specs=[
                pl.BlockSpec((TB, D), lambda i: (i, 0)),
                pl.BlockSpec((TB, D), lambda i: (i, 0)),
                pl.BlockSpec((TB, 1), lambda i: (i, 0)),
            ],
            out_specs=pl.BlockSpec((1, 8, 128), lambda i: (i, 0, 0)),
        ),
        compiler_params=pltpu.CompilerParams(
            dimension_semantics=("parallel",),
            vmem_limit_bytes=vmem_limit,
        ),
    )(z1, z2, y2d)

    # Final reduction + fused scale (0.5 per-sample factor and 1/B mean).
    return jnp.sum(partials[:, 0, 0]) / (2.0 * B)


def _reference_loss(z1, z2, y, margin=2.0):
    diff = z1.astype(jnp.float32) - z2.astype(jnp.float32)
    d2 = jnp.sum(diff ** 2, axis=1)
    dist = jnp.sqrt(d2)
    neg = jnp.maximum(margin - dist, 0.0)
    loss = (y * d2 + (1.0 - y) * neg ** 2) / 2.0
    return jnp.sum(loss) / z1.shape[0]


if __name__ == "__main__":
    key = jax.random.PRNGKey(0)
    k1, k2, k3 = jax.random.split(key, 3)

    # Primary check: f32 inputs, small shapes (single tile, no masking path).
    B, D = 8, 32
    z1 = jax.random.normal(k1, (B, D), dtype=jnp.float32)
    z2 = jax.random.normal(k2, (B, D), dtype=jnp.float32)
    y = jax.random.bernoulli(k3, 0.5, (B,)).astype(jnp.float32)

    loss = contrastive_loss(z1, z2, y, margin=2.0)
    jax.block_until_ready(loss)
    ref = _reference_loss(z1, z2, y, margin=2.0)
    assert jnp.allclose(loss, ref, rtol=1e-5, atol=1e-5), (loss, ref)

    # Secondary check: batch not a multiple of the tile (exercises cdiv + gated
    # last-tile masking) and bf16 inputs (kernel upcasts in-VMEM).
    B2, D2 = 20, 32
    k4, k5, k6 = jax.random.split(k3, 3)
    z1b = jax.random.normal(k4, (B2, D2), dtype=jnp.bfloat16)
    z2b = jax.random.normal(k5, (B2, D2), dtype=jnp.bfloat16)
    yb = jax.random.bernoulli(k6, 0.5, (B2,)).astype(jnp.float32)

    loss_b = contrastive_loss(z1b, z2b, yb, margin=2.0)
    jax.block_until_ready(loss_b)
    ref_b = _reference_loss(z1b, z2b, yb, margin=2.0)
    assert jnp.allclose(loss_b, ref_b, rtol=1e-4, atol=1e-4), (loss_b, ref_b)

    # Third check: multi-tile grid with a ragged tail (exercises both pl.when
    # branches: full tiles unmasked, last tile masked).
    B3, D3 = 70, 32
    k7, k8, k9 = jax.random.split(k6, 3)
    z1c = jax.random.normal(k7, (B3, D3), dtype=jnp.float32)
    z2c = jax.random.normal(k8, (B3, D3), dtype=jnp.float32)
    yc = jax.random.bernoulli(k9, 0.5, (B3,)).astype(jnp.float32)

    loss_c = contrastive_loss(z1c, z2c, yc, margin=2.0)
    jax.block_until_ready(loss_c)
    ref_c = _reference_loss(z1c, z2c, yc, margin=2.0)
    assert jnp.allclose(loss_c, ref_c, rtol=1e-5, atol=1e-5), (loss_c, ref_c)

    print("KERNEL_OK")
</pallas_src>

<mosaic_0001>
module attributes {stable_mosaic.version = 11 : i64} {
  func.func @_contrastive_loss_kernel(%arg0: i32, %arg1: memref<8x32xf32, #tpu.memory_space<vmem>>, %arg2: memref<8x32xf32, #tpu.memory_space<vmem>>, %arg3: memref<8x1xf32, #tpu.memory_space<vmem>>, %arg4: memref<1x8x128xf32, #tpu.memory_space<vmem>>) attributes {dimension_semantics = [#tpu.dimension_semantics<parallel>], iteration_bounds = array<i64: 1>, scalar_prefetch = 0 : i64, scratch_operands = 0 : i64, tpu.core_type = #tpu.core_type<tc>, window_params = [{transform_indices = @transform_0, window_bounds = array<i64: 8, 32>}, {transform_indices = @transform_1, window_bounds = array<i64: 8, 32>}, {transform_indices = @transform_2, window_bounds = array<i64: 8, 1>}, {transform_indices = @transform_3, window_bounds = array<i64: 1, 8, 128>}]} {
    %c0 = arith.constant 0 : index
    %c0_0 = arith.constant 0 : index
    %0 = vector.load %arg1[%c0, %c0_0] : memref<8x32xf32, #tpu.memory_space<vmem>>, vector<8x32xf32>
    %c0_1 = arith.constant 0 : index
    %c0_2 = arith.constant 0 : index
    %1 = vector.load %arg2[%c0_1, %c0_2] : memref<8x32xf32, #tpu.memory_space<vmem>>, vector<8x32xf32>
    %c0_3 = arith.constant 0 : index
    %c0_4 = arith.constant 0 : index
    %2 = vector.load %arg3[%c0_3, %c0_4] : memref<8x1xf32, #tpu.memory_space<vmem>>, vector<8x1xf32>
    %3 = arith.subf %0, %1 : vector<8x32xf32>
    %4 = arith.mulf %3, %3 : vector<8x32xf32>
    %cst = arith.constant dense<0.000000e+00> : vector<8xf32>
    %5 = vector.multi_reduction <add>, %4, %cst [1] : vector<8x32xf32> to vector<8xf32>
    %6 = vector.shape_cast %5 : vector<8xf32> to vector<8x1xf32>
    %7 = math.sqrt %6 : vector<8x1xf32>
    %cst_5 = arith.constant 2.000000e+00 : f32
    %8 = vector.broadcast %cst_5 : f32 to vector<8x1xf32>
    %9 = arith.subf %8, %7 : vector<8x1xf32>
    %cst_6 = arith.constant 0.000000e+00 : f32
    %10 = vector.broadcast %cst_6 : f32 to vector<8x1xf32>
    %11 = arith.maximumf %9, %10 : vector<8x1xf32>
    %cst_7 = arith.constant 1.000000e+00 : f32
    %12 = vector.broadcast %cst_7 : f32 to vector<8x1xf32>
    %13 = arith.subf %12, %2 : vector<8x1xf32>
    %14 = arith.mulf %11, %11 : vector<8x1xf32>
    %15 = arith.subf %14, %6 : vector<8x1xf32>
    %16 = arith.mulf %13, %15 : vector<8x1xf32>
    %17 = arith.addf %6, %16 : vector<8x1xf32>
    %18 = vector.shape_cast %17 : vector<8x1xf32> to vector<1x8x1xf32>
    %cst_8 = arith.constant dense<0.000000e+00> : vector<1xf32>
    %19 = vector.multi_reduction <add>, %18, %cst_8 [1, 2] : vector<1x8x1xf32> to vector<1xf32>
    %20 = vector.shape_cast %19 : vector<1xf32> to vector<1x1x1xf32>
    %21 = vector.extract %20[0, 0, 0] : f32 from vector<1x1x1xf32>
    %22 = vector.broadcast %21 : f32 to vector<1x1x1xf32>
    %23 = vector.shape_cast %22 : vector<1x1x1xf32> to vector<1x1x1xf32>
    %24 = vector.broadcast %23 : vector<1x1x1xf32> to vector<1x8x128xf32>
    %c0_9 = arith.constant 0 : index
    %c0_10 = arith.constant 0 : index
    %c0_11 = arith.constant 0 : index
    %25 = vector.load %arg4[%c0_9, %c0_10, %c0_11] : memref<1x8x128xf32, #tpu.memory_space<vmem>>, vector<1x8x128xf32>
    tpu.vector_store %arg4[%c0_9, %c0_10, %c0_11], %24 {strides = array<i32>} : memref<1x8x128xf32, #tpu.memory_space<vmem>>, vector<1x8x128xf32>,
    return
  }
  func.func @transform_0(%arg0: i32) -> (i32, i32) {
    %c0_i32 = arith.constant 0 : i32
    %c0_i32_0 = arith.constant 0 : i32
    return %arg0, %c0_i32 : i32, i32
  }
  func.func @transform_1(%arg0: i32) -> (i32, i32) {
    %c0_i32 = arith.constant 0 : i32
    %c0_i32_0 = arith.constant 0 : i32
    return %arg0, %c0_i32 : i32, i32
  }
  func.func @transform_2(%arg0: i32) -> (i32, i32) {
    %c0_i32 = arith.constant 0 : i32
    %c0_i32_0 = arith.constant 0 : i32
    return %arg0, %c0_i32 : i32, i32
  }
  func.func @transform_3(%arg0: i32) -> (i32, i32, i32) {
    %c0_i32 = arith.constant 0 : i32
    %c0_i32_0 = arith.constant 0 : i32
    %c0_i32_1 = arith.constant 0 : i32
    return %arg0, %c0_i32, %c0_i32_0 : i32, i32, i32
  }
}

</mosaic_0001>

<bundles_post_ra>
// kernel: tpu_custom_call.1
= control target key start
LH: loop header
LB: loop body
LE: loop exit
PB: predicated region body
PF: predicated region fallthrough
CT: control target
= control target key end

     0   :  { %8 = vsyncpa [#allocation3], 0  ;;  %s184_s0 = inlined_call_operand.vmem [shape: f32[8,32], index: 0, kind: input, shape index: {}]   ;;  %s185_s1 = inlined_call_operand.hbm [shape: f32[8,32], index: 1, kind: input, shape index: {}]   ;;  %s186_s2 = inlined_call_operand.vmem [shape: f32[8,1], index: 2, kind: input, shape index: {}]   ;;  %s187_s3 = inlined_call_operand.hbm [shape: f32[1,8,128], index: 3, kind: output, shape index: {}]  }
   0x1   :  { %9 = vsyncpa [#allocation4], 0  ;;  %s132_s12 = smov [#allocation2]   ;;  %s84_s16 = scalar_lea.hbm %s185_s1, 128 }
   0x2   :  { %s18_s13 = sshll.u32 %s132_s12, 4  ;;  %p85_p0 = scmp.ne.s32.totalorder %s185_s1, %s84_s16  ;;  %s19_s13 = int_to_ptr.vmem [resolvable:$true] %s18_s13 }
   0x3   :  { %p88_p1 = scmp.lt.u32.totalorder %s84_s16, %s185_s1 }
   0x5   :  { %p90_p2 = pnand %p88_p1, %p85_p0 }
   0x7   :  { %93 = shalt.err (!%p90_p2)
}
   0x8   :  { %s94_s21 = scalar_lea.vmem %s19_s13, 128  ;;  %p99_p4 = scmp.lt.s32.totalorder %s19_s13, %s19_s13 }
   0x9   :  { %p95_p3 = scmp.ne.s32.totalorder %s19_s13, %s94_s21  ;;  %p100_p5 = scmp.lt.s32.totalorder %s94_s21, %s94_s21 }
   0xb   :  { %p101_p6 = por %p100_p5, %p99_p4 }
   0xd   :  { %p102_p7 = pnand %p101_p6, %p95_p3 }
   0xf   :  { %105 = shalt.err (!%p102_p7)
}
  0x10   :  { %21 = dma.hbm_to_vmem [thread:$0]  %s185_s1, 128, %s19_s13, [#allocation3]  }
  0x11   :  { %128 = dma.done.wait [#allocation3], 128  }
  0x12   :  { %129 = vsyncadd [#allocation3], 4294967168  ;;  %v27_v0 = vld [vmem:[%s184_s0] sm:$0xff]  ;;  %vm32_vm0 = vcmask 261120   ;;  %vm50_vm3 = vcmask 7168   ;;  %s133_s0 = smov [#allocation5]  }
  0x13   :  { %v28_v1 = vld [vmem:[#allocation2] sm:$0xff]  ;;  %s69_s27 = sshll.u32 %s133_s0, 4  ;;  %s70_s27 = int_to_ptr.vmem [resolvable:$true] %s69_s27 }
  0x14   :  { %v30_v2 = vsub.f32 %v27_v0, %v28_v1  ;;  %v29_v12 = vld [vmem:[%s186_s2] sm:$0xff]  ;;  %s106_s28 = scalar_lea.vmem %s70_s27, 128  ;;  %p111_p9 = scmp.lt.s32.totalorder %s70_s27, %s70_s27 }
  0x15   :  { %v45_v14 = vsub.f32 1.0, %v29_v12  ;;  %p107_p8 = scmp.ne.s32.totalorder %s70_s27, %s106_s28  ;;  %p112_p10 = scmp.lt.s32.totalorder %s106_s28, %s106_s28 }
  0x16   :  { %v31_v3 = vmul.f32 %v30_v2, %v30_v2 }
  0x17   :  { %p113_p11 = por %p112_p10, %p111_p9 }
  0x18   :  { %v33_v4 = vsel %vm32_vm0, %v31_v3, 0.0 }
  0x19   :  { %34 = vadd.xlane.f32.xlu0 %v33_v4  ;;  %p114_p12 = pnand %p113_p11, %p107_p8 }
  0xa6   :  { %v35_v5 = vpop.xlane.xlu0 %34 }
  0xa7   :  { %82 = vrsqrt.f32 %v35_v5  ;;  %vm38_vm1 = vcmp.eq.f32.partialorder %v35_v5, inf  ;;  %v41_v8 = vand.u32 2147483648, %v35_v5  ;;  %vm40_vm2 = vcmp.eq.f32.partialorder %v35_v5, 0.0 }
  0xb1   :  { %v83_v6 = vpop.eup %82 }
  0xb2   :  { %v37_v7 = vmul.f32 %v83_v6, %v35_v5 }
  0xb4   :  { %v39_v9 = vsel %vm38_vm1, %v35_v5, %v37_v7 }
  0xb5   :  { %v42_v10 = vsel %vm40_vm2, %v41_v8, %v39_v9 }
  0xb6   :  { %v43_v11 = vsub.f32 2.0, %v42_v10 }
  0xb8   :  { %v44_v13 = vmax.f32 %v43_v11, 0.0 }
  0xba   :  { %v46_v15 = vmul.f32 %v44_v13, %v44_v13 }
  0xbc   :  { %v47_v16 = vsub.f32 %v46_v15, %v35_v5 }
  0xbe   :  { %v48_v17 = vmul.f32 %v47_v16, %v45_v14 }
  0xc0   :  { %v49_v18 = vadd.f32 %v48_v17, %v35_v5 }
  0xc2   :  { %v51_v19 = vsel %vm50_vm3, %v49_v18, 0.0 }
  0xc3   :  { %52 = vadd.xlane.f32.xlu0 %v51_v19 }
 0x150   :  { %v53_v20 = vpop.xlane.xlu0 %52 }
 0x151   :  { %v54_v21 = vrot.slane %v53_v20, 4 }
 0x153   :  { %v55_v22 = vadd.f32 %v54_v21, %v53_v20 }
 0x155   :  { %v56_v23 = vrot.slane %v55_v22, 2 }
 0x157   :  { %v57_v24 = vadd.f32 %v56_v23, %v55_v22 }
 0x159   :  { %v58_v25 = vrot.slane %v57_v24, 1 }
 0x15b   :  { %v59_v26 = vadd.f32 %v58_v25, %v57_v24 }
 0x15d   :  { %78 = vpush %v59_v26 }
 0x18e   :  { %s79_s2 = spop %78 }
 0x18f   :  { %v61_v27 = vstv %s79_s2 }
 0x190   :  { %62 = vst [vmem:[#allocation5] sm:$0xff] %v61_v27 }
 0x191   :  { %117 = shalt.err (!%p114_p12)
}
 0x192   :  { %s118_s4 = scalar_lea.hbm %s187_s3, 128 }
 0x193   :  { %p119_p13 = scmp.ne.s32.totalorder %s187_s3, %s118_s4  ;;  %p122_p0 = scmp.lt.u32.totalorder %s118_s4, %s187_s3 }
 0x195   :  { %p124_p1 = pnand %p122_p0, %p119_p13 }
 0x197   :  { %127 = shalt.err (!%p124_p1)
}
 0x198   :  { %72 = dma.vmem_to_hbm [thread:$0]  %s70_s27, 128, %s187_s3, [#allocation4]  }
 0x199   :  { %130 = dma.done.wait [#allocation4], 128  }
 0x19a   :  { %131 = vsyncadd [#allocation4], 4294967168 }
 0x19b   :  { %76 = vsyncpa [#allocation3], 1 }
 0x19c   :  { %77 = vsyncpa [#allocation4], 1 }

</bundles_post_ra>
